<compile_context>
chip_gen: v7x
topology: tpu7x:2x2x1
jax: 0.10.0
libtpu: 0.0.40
codegen_flags: <defaults>
</compile_context>

<pallas_src>
import functools

import jax
import jax.numpy as jnp
from jax.experimental import pallas as pl
from jax.experimental.pallas import tpu as pltpu


def _int_pow(x, n):
    """x**n for a static positive integer n via square-and-multiply (VPU only)."""
    assert n >= 1
    result = None
    base = x
    while n > 0:
        if n & 1:
            result = base if result is None else result * base
        n >>= 1
        if n:
            base = base * base
    return result


def _gem_pow_mean_kernel(p_ref, x_ref, o_ref, *, eps, p_static):
    # p_ref: (1,) f32 scalar parameter in SMEM (unused when p_static is given)
    # x_ref: (rows_per_block, H*W) input tile in VMEM
    # o_ref: (rows_per_block, 1) f32 per-row mean of clamp(x, eps)**p
    x = x_ref[...].astype(jnp.float32)
    xc = jnp.maximum(x, eps)                      # clamp(min=eps), eps > 0

    if p_static is not None:
        # Static integer p: repeated multiplies on the VPU (no EUP pressure).
        xp = _int_pow(xc, p_static)
    else:
        # Traced / learned p: x**p = exp(p * log(x)), safe since xc >= eps > 0.
        xp = jnp.exp(p_ref[0] * jnp.log(xc))

    # avg_pool2d over the full spatial extent == mean over the lane axis.
    o_ref[...] = jnp.mean(xp, axis=-1, keepdims=True).astype(o_ref.dtype)


def _choose_rows_per_block(rows, hw, in_itemsize,
                           target_block_bytes=2 * 1024 * 1024,
                           min_block_bytes=256 * 1024,
                           min_steps=4):
    """Block height: ~2 MiB of *padded f32* working set, sublane-aligned,
    capped so blocks never exceed the row extent, with >=4 / even grid steps
    when there is enough work (keeps both v7x TensorCores busy)."""
    sublane = max(8, 32 // max(1, in_itemsize))   # 8 f32, 16 bf16, 32 int8/fp8
    if rows <= sublane:
        return rows                               # single block == full row dim

    padded_hw = pl.cdiv(hw, 128) * 128            # lanes pad to 128 in VMEM
    row_bytes = padded_hw * 4                     # f32 working set per row

    def align_down(r):
        return max(sublane, (r // sublane) * sublane)

    rpb = align_down(target_block_bytes // row_bytes)
    rpb = min(rpb, align_down(rows))

    steps = pl.cdiv(rows, rpb)
    if steps < min_steps:
        cand = align_down(pl.cdiv(rows, min_steps))
        if cand * row_bytes >= min_block_bytes:
            rpb = cand
            steps = pl.cdiv(rows, rpb)
    if steps > 1 and steps % 2 == 1:
        cand = align_down(pl.cdiv(rows, steps + 1))
        if pl.cdiv(rows, cand) % 2 == 0 and cand * row_bytes >= min_block_bytes:
            rpb = cand
    return rpb


def gem_pooling_pallas(x, p_param, eps=1e-6, p_static=None, rows_per_block=None):
    """GeM pooling.  x: (N, C, H, W), p_param: (1,) f32  ->  (N, C, 1, 1).

    p_static: optional Python int; when given, x**p uses square-and-multiply
    (inference fast path).  Otherwise the learned p_param is used, matching
    the nn.Module forward with a trainable p.
    """
    assert eps > 0.0, "eps must be > 0 (log/clamp safety)"
    if p_static is not None:
        assert isinstance(p_static, int) and p_static >= 1

    N, C, H, W = x.shape
    rows = N * C
    hw = H * W
    x2d = x.reshape(rows, hw)

    if rows_per_block is None:
        rows_per_block = _choose_rows_per_block(rows, hw, x2d.dtype.itemsize)
    rows_per_block = min(rows_per_block, rows)
    grid = (pl.cdiv(rows, rows_per_block),)       # ragged tail handled by clipping

    kernel = functools.partial(_gem_pow_mean_kernel, eps=eps, p_static=p_static)

    # Per-row mean of clamp(x,eps)**p, in f32.  Out-of-bounds tail rows in the
    # last block compute garbage but their writes are clipped to (rows, 1).
    pooled = pl.pallas_call(
        kernel,
        out_shape=jax.ShapeDtypeStruct((rows, 1), jnp.float32),
        grid_spec=pltpu.PrefetchScalarGridSpec(
            num_scalar_prefetch=0,
            grid=grid,
            in_specs=[
                # p: whole (1,) array in SMEM (scalar parameter)
                pl.BlockSpec(memory_space=pltpu.MemorySpace.SMEM),
                # x: (rows_per_block, hw) VMEM tiles streamed over rows;
                #    lane axis is the full H*W extent so any hw is legal.
                pl.BlockSpec((rows_per_block, hw), lambda i: (i, 0)),
            ],
            out_specs=pl.BlockSpec((rows_per_block, 1), lambda i: (i, 0)),
        ),
        compiler_params=pltpu.CompilerParams(
            dimension_semantics=("parallel",),
            # ~2 MiB padded blocks: 2 input buffers + f32 temporaries stay
            # around ~10 MiB, comfortably inside 32 MiB scoped VMEM on
            # v5e/v6e (128 MiB physical) and v7x (64 MiB physical per core).
            vmem_limit_bytes=32 * 1024 * 1024,
        ),
    )(p_param, x2d)

    # Final (1/p) root on the tiny (N*C,) result: lane-dense for free in XLA,
    # avoids duplicating EUP work on a 1-lane column inside the kernel.
    pooled = pooled.reshape(N, C, 1, 1)
    if p_static is not None:
        inv_p = jnp.float32(1.0 / p_static)
    else:
        inv_p = 1.0 / p_param.astype(jnp.float32).reshape(())
    out = pooled ** inv_p                          # pooled >= eps**p > 0
    return out.astype(x.dtype)


def gem_pooling_ref(x, p, eps=1e-6):
    """Pure-JAX reference matching the PyTorch semantics."""
    xc = jnp.maximum(x, eps)
    return jnp.mean(xc ** p, axis=(-2, -1), keepdims=True) ** (1.0 / p)


if __name__ == "__main__":
    key = jax.random.PRNGKey(0)
    N, C, H, W = 2, 4, 16, 16
    x = jax.random.uniform(key, (N, C, H, W), dtype=jnp.float32) * 2.0 - 0.5

    # Parameter init in the module: nn.Parameter(torch.ones(1) * 3)
    p_param = jnp.ones((1,), dtype=jnp.float32) * 3.0
    eps = 1e-6

    ref = gem_pooling_ref(x, p_param[0], eps=eps)

    # 1) Learned / traced-p path (matches GeM.forward exactly).
    out = gem_pooling_pallas(x, p_param, eps=eps)
    out = jax.block_until_ready(out)
    assert out.shape == (N, C, 1, 1), out.shape
    assert jnp.allclose(out, ref, rtol=1e-4, atol=1e-5), (
        f"max abs diff = {jnp.max(jnp.abs(out - ref))}"
    )

    # 2) Static-p fast path (inference-style, p known at trace time).
    out_s = gem_pooling_pallas(x, p_param, eps=eps, p_static=3)
    out_s = jax.block_until_ready(out_s)
    assert jnp.allclose(out_s, ref, rtol=1e-4, atol=1e-5), (
        f"max abs diff (static p) = {jnp.max(jnp.abs(out_s - ref))}"
    )

    print("KERNEL_OK")
</pallas_src>

<mosaic_0001>
module attributes {stable_mosaic.version = 11 : i64} {
  func.func @_gem_pow_mean_kernel(%arg0: i32, %arg1: memref<1xf32, #tpu.memory_space<smem>>, %arg2: memref<8x256xf32, #tpu.memory_space<vmem>>, %arg3: memref<8x1xf32, #tpu.memory_space<vmem>>) attributes {dimension_semantics = [#tpu.dimension_semantics<parallel>], iteration_bounds = array<i64: 1>, scalar_prefetch = 0 : i64, scratch_operands = 0 : i64, tpu.core_type = #tpu.core_type<tc>, window_params = [{transform_indices = @transform_0, window_bounds = array<i64: 1>}, {transform_indices = @transform_1, window_bounds = array<i64: 8, 256>}, {transform_indices = @transform_2, window_bounds = array<i64: 8, 1>}]} {
    %c0 = arith.constant 0 : index
    %c0_0 = arith.constant 0 : index
    %0 = vector.load %arg2[%c0, %c0_0] : memref<8x256xf32, #tpu.memory_space<vmem>>, vector<8x256xf32>
    %cst = arith.constant 9.99999997E-7 : f32
    %1 = vector.broadcast %cst : f32 to vector<8x256xf32>
    %2 = arith.maximumf %0, %1 : vector<8x256xf32>
    %c0_1 = arith.constant 0 : index
    %3 = memref.load %arg1[%c0_1] : memref<1xf32, #tpu.memory_space<smem>>
    %4 = math.log %2 : vector<8x256xf32>
    %5 = vector.broadcast %3 : f32 to vector<8x256xf32>
    %6 = arith.mulf %5, %4 : vector<8x256xf32>
    %7 = math.exp %6 : vector<8x256xf32>
    %cst_2 = arith.constant dense<0.000000e+00> : vector<8xf32>
    %8 = vector.multi_reduction <add>, %7, %cst_2 [1] : vector<8x256xf32> to vector<8xf32>
    %9 = vector.shape_cast %8 : vector<8xf32> to vector<8x1xf32>
    %cst_3 = arith.constant 2.560000e+02 : f32
    %10 = vector.broadcast %cst_3 : f32 to vector<8x1xf32>
    %11 = arith.divf %9, %10 : vector<8x1xf32>
    %c0_4 = arith.constant 0 : index
    %c0_5 = arith.constant 0 : index
    %12 = vector.load %arg3[%c0_4, %c0_5] : memref<8x1xf32, #tpu.memory_space<vmem>>, vector<8x1xf32>
    tpu.vector_store %arg3[%c0_4, %c0_5], %11 {strides = array<i32>} : memref<8x1xf32, #tpu.memory_space<vmem>>, vector<8x1xf32>,
    return
  }
  func.func @transform_0(%arg0: i32) -> i32 {
    %c0_i32 = arith.constant 0 : i32
    %c0_i32_0 = arith.constant 0 : i32
    return %c0_i32 : i32
  }
  func.func @transform_1(%arg0: i32) -> (i32, i32) {
    %c0_i32 = arith.constant 0 : i32
    %c0_i32_0 = arith.constant 0 : i32
    return %arg0, %c0_i32 : i32, i32
  }
  func.func @transform_2(%arg0: i32) -> (i32, i32) {
    %c0_i32 = arith.constant 0 : i32
    %c0_i32_0 = arith.constant 0 : i32
    return %arg0, %c0_i32 : i32, i32
  }
}

</mosaic_0001>

<bundles_post_ra>
// kernel: tpu_custom_call.1
= control target key start
LH: loop header
LB: loop body
LE: loop exit
PB: predicated region body
PF: predicated region fallthrough
CT: control target
= control target key end

     0   :  { %8 = vsyncpa [#allocation4], 0  ;;  %s85_s9 = smov [#allocation3]   ;;  %s119_s0 = inlined_call_operand.<no memory space> [shape: f32[1], index: 0, kind: input, shape index: {}]   ;;  %s120_s1 = inlined_call_operand.hbm [shape: f32[8,256], index: 1, kind: input, shape index: {}]   ;;  %s121_s2 = inlined_call_operand.vmem [shape: f32[8,1], index: 2, kind: output, shape index: {}]  }
   0x1   :  { %s17_s10 = sshll.u32 %s85_s9, 4  ;;  %s61_s13 = scalar_lea.hbm %s120_s1, 256  ;;  %s18_s10 = int_to_ptr.vmem [resolvable:$true] %s17_s10 }
   0x2   :  { %p62_p0 = scmp.ne.s32.totalorder %s120_s1, %s61_s13  ;;  %p65_p1 = scmp.lt.u32.totalorder %s61_s13, %s120_s1 }
   0x4   :  { %p67_p2 = pnand %p65_p1, %p62_p0 }
   0x6   :  { %70 = shalt.err (!%p67_p2)
}
   0x7   :  { %s71_s18 = scalar_lea.vmem %s18_s10, 256  ;;  %p76_p4 = scmp.lt.s32.totalorder %s18_s10, %s18_s10 }
   0x8   :  { %p72_p3 = scmp.ne.s32.totalorder %s18_s10, %s71_s18  ;;  %p77_p5 = scmp.lt.s32.totalorder %s71_s18, %s71_s18 }
   0xa   :  { %p78_p6 = por %p77_p5, %p76_p4 }
   0xc   :  { %p79_p7 = pnand %p78_p6, %p72_p3 }
   0xe   :  { %82 = shalt.err (!%p79_p7)
}
   0xf   :  { %20 = dma.hbm_to_vmem [thread:$0]  %s120_s1, 256, %s18_s10, [#allocation4]  }
  0x10   :  { %83 = dma.done.wait [#allocation4], 256  }
  0x11   :  { %84 = vsyncadd [#allocation4], 4294967040  ;;  %v24_v0 = vld [vmem:[#allocation3] sm:$0xff]  ;;  %v25_v1 = vld [vmem:[#allocation3 + $0x8] sm:$0xff]  ;;  %v33_v5 = vstv %s119_s0  ;;  %vm45_vm0 = vcmask 7168  }
  0x12   :  { %v26_v2 = vmax.f32 %v24_v0, 1e-06  ;;  %v27_v3 = vmax.f32 %v25_v1, 1e-06 }
  0x14   :  { %53 = vlog2.f32 %v26_v2 }
  0x15   :  { %55 = vlog2.f32 %v27_v3 }
  0x1e   :  { %v54_v4 = vpop.eup %53 }
  0x1f   :  { %v56_v6 = vpop.eup %55  ;;  %v30_v7 = vmul.f32 0.6931472, %v54_v4 }
  0x20   :  { %v32_v8 = vmul.f32 0.6931472, %v56_v6 }
  0x21   :  { %v34_v9 = vmul.f32 %v33_v5, %v30_v7 }
  0x22   :  { %v35_v10 = vmul.f32 %v33_v5, %v32_v8 }
  0x23   :  { %v36_v11 = vmul.f32 1.442695, %v34_v9 }
  0x24   :  { %v38_v12 = vmul.f32 1.442695, %v35_v10 }
  0x25   :  { %57 = vpow2.f32 %v36_v11 }
  0x26   :  { %59 = vpow2.f32 %v38_v12 }
  0x2f   :  { %v58_v13 = vpop.eup %57 }
  0x30   :  { %v60_v14 = vpop.eup %59 }
  0x31   :  { %v40_v15 = vadd.f32 %v60_v14, %v58_v13 }
  0x33   :  { %41 = vadd.xlane.f32.xlu0 %v40_v15 }
  0xc0   :  { %v42_v16 = vpop.xlane.xlu0 %41 }
  0xc1   :  { %v44_v17 = vmul.f32 0.00390625, %v42_v16 }
  0xc3   :  { %46 = vst.msk [vmem:[%s121_s2] sm:$0xff] %vm45_vm0, %v44_v17 }
  0xc4   :  { %51 = vsyncpa [#allocation4], 1 }

</bundles_post_ra>
